<compile_context>
chip_gen: v5e
topology: v5e:2x2
jax: 0.10.0
libtpu: 0.0.40
codegen_flags: <defaults>
</compile_context>

<pallas_src>
import jax
import jax.numpy as jnp
from jax.experimental import pallas as pl
from jax.experimental.pallas import tpu as pltpu  # noqa: F401  (TPU backend)


def _conv1x1_kernel(w_ref, x_ref, o_ref):
    # w_ref: (Cout, Cin)   x_ref: (Cin, M)   o_ref: (Cout, M)  (lane-dense)
    o_ref[...] = jnp.dot(
        w_ref[...], x_ref[...], preferred_element_type=jnp.float32
    ).astype(o_ref.dtype)


def conv2d_1x1(x_nchw, weight_oi11):
    """1x1 stride-1 conv, no bias.  x_nchw: (N, Cin, H, W), weight: (Cout, Cin, 1, 1)."""
    n, cin, h, w = x_nchw.shape
    cout = weight_oi11.shape[0]
    m = n * h * w

    # Build X as (Cin, N*H*W).  For N == 1 this is a pure reshape (no data
    # movement); for N > 1 move N behind C so channels remain the contraction.
    if n == 1:
        x_mat = x_nchw.reshape(cin, m)
    else:
        x_mat = jnp.transpose(x_nchw, (1, 0, 2, 3)).reshape(cin, m)

    w_mat = weight_oi11.reshape(cout, cin)  # (Cout, Cin) — no transpose needed.

    itemsize = jnp.dtype(x_mat.dtype).itemsize
    cost = pl.CostEstimate(
        flops=2 * m * cin * cout,
        transcendentals=0,
        bytes_accessed=(w_mat.size + x_mat.size + cout * m) * itemsize,
    )

    out_mat = pl.pallas_call(
        _conv1x1_kernel,
        out_shape=jax.ShapeDtypeStruct((cout, m), x_mat.dtype),
        # Single grid step: full-array VMEM-resident blocks (grid is empty).
        in_specs=[
            pl.BlockSpec((cout, cin), lambda: (0, 0)),
            pl.BlockSpec((cin, m), lambda: (0, 0)),
        ],
        out_specs=pl.BlockSpec((cout, m), lambda: (0, 0)),
        cost_estimate=cost,
    )(w_mat, x_mat)

    # (Cout, N*H*W) -> (Cout, N, H, W) -> NCHW.  For N == 1 these are cheap.
    return jnp.transpose(out_mat.reshape(cout, n, h, w), (1, 0, 2, 3))


if __name__ == "__main__":
    key = jax.random.PRNGKey(0)
    k_x, k_w = jax.random.split(key)

    # Shapes implied by the module: input (1, 88, 28, 28), weight (88, 88, 1, 1).
    x = jax.random.normal(k_x, (1, 88, 28, 28), dtype=jnp.float32)
    weight = jax.random.normal(k_w, (88, 88, 1, 1), dtype=jnp.float32) * 0.05

    out = conv2d_1x1(x, weight)
    out = jax.block_until_ready(out)

    # Sanity check against a plain-JAX reference (same math, no Pallas).
    ref = jnp.einsum("nchw,oc->nohw", x, weight.reshape(88, 88))
    assert out.shape == (1, 88, 28, 28)
    assert jnp.allclose(out, ref, atol=1e-4, rtol=1e-4)

    print("KERNEL_OK")
</pallas_src>

<mosaic_0001>
module attributes {stable_mosaic.version = 11 : i64} {
  func.func @_conv1x1_kernel(%arg0: memref<88x88xf32, #tpu.memory_space<vmem>>, %arg1: memref<88x784xf32, #tpu.memory_space<vmem>>, %arg2: memref<88x784xf32, #tpu.memory_space<vmem>>) attributes {dimension_semantics = [], scalar_prefetch = 0 : i64, scratch_operands = 0 : i64, tpu.core_type = #tpu.core_type<tc>} {
    %c0 = arith.constant 0 : index
    %c0_0 = arith.constant 0 : index
    %0 = vector.load %arg0[%c0, %c0_0] : memref<88x88xf32, #tpu.memory_space<vmem>>, vector<88x88xf32>
    %c0_1 = arith.constant 0 : index
    %c0_2 = arith.constant 0 : index
    %1 = vector.load %arg1[%c0_1, %c0_2] : memref<88x784xf32, #tpu.memory_space<vmem>>, vector<88x784xf32>
    %cst = arith.constant dense<0.000000e+00> : vector<88x784xf32>
    %2 = tpu.matmul %0, %1, %cst {dimension_numbers = #tpu.dot_dimension_numbers<[1], [0], [0], [1], [0, 0, 1, 1], [], []>} : vector<88x88xf32>, vector<88x784xf32>, vector<88x784xf32> -> vector<88x784xf32>
    %c0_3 = arith.constant 0 : index
    %c0_4 = arith.constant 0 : index
    %3 = vector.load %arg2[%c0_3, %c0_4] : memref<88x784xf32, #tpu.memory_space<vmem>>, vector<88x784xf32>
    tpu.vector_store %arg2[%c0_3, %c0_4], %2 {strides = array<i32>} : memref<88x784xf32, #tpu.memory_space<vmem>>, vector<88x784xf32>,
    return
  }
}

</mosaic_0001>

<bundles_post_ra>
// kernel: tpu_custom_call.1
= control target key start
LH: loop header
LB: loop body
LE: loop exit
PB: predicated region body
PF: predicated region fallthrough
CT: control target
= control target key end

     0   :  { %7 = vsyncpa [#allocation3], 0  ;;  %s1109_s0 = inlined_call_operand.hbm [shape: f32[88,88], index: 0, kind: input, shape index: {}]   ;;  %s1110_s1 = inlined_call_operand.hbm [shape: f32[88,784], index: 1, kind: input, shape index: {}]   ;;  %s1111_s2 = inlined_call_operand.hbm [shape: f32[88,784], index: 2, kind: output, shape index: {}]  }
   0x1   :  { %8 = vsyncpa [#allocation6], 0 }
   0x2   :  { %9 = vsyncpa [#allocation4], 0  ;;  %s14_s11 = sshll.u32 %s1109_s0, 4  ;;  %s809_s12 = smov [#allocation2]   ;;  %s15_s11 = int_to_ptr.hbm [resolvable:$true] %s14_s11 }
   0x3   :  { %s16_s13 = sshll.u32 %s809_s12, 4  ;;  %s27_s16 = sshll.u32 %s1110_s1, 4  ;;  %s17_s13 = int_to_ptr.vmem [resolvable:$true] %s16_s13  ;;  %s28_s16 = int_to_ptr.hbm [resolvable:$true] %s27_s16 }
   0x4   :  { %s810_s17 = smov 128   ;;  %s811_s18 = smov 8  }
   0x5   :  { %22 = dma.hbm_to_vmem [thread:$0]  %s15_s11, 1408, %s17_s13, [#allocation3], %s810_s17, %s810_s17, %s811_s18  }
   0x6   :  { %s812_s19 = smov [#allocation5]   ;;  %s813_s21 = smov 896  }
   0x7   :  { %s29_s20 = sshll.u32 %s812_s19, 4  ;;  %s814_s22 = smov 56   ;;  %s30_s20 = int_to_ptr.vmem [resolvable:$true] %s29_s20 }
   0x8   :  { %35 = dma.hbm_to_vmem [thread:$0]  %s28_s16, 9856, %s30_s20, [#allocation6], %s813_s21, %s813_s21, %s814_s22  }
   0x9   :  { %803 = dma.done.wait [#allocation3], 1408  }
   0xa   :  { %804 = vsyncadd [#allocation3], 4294965888 }
   0xb   :  { %805 = dma.done.wait [#allocation6], 9856  }
   0xc   :  { %806 = vsyncadd [#allocation6], 4294957440  ;;  %v127_v0 = vld [vmem:[#allocation5 + $0x240] sm:$0xff]  ;;  %v120_v1 = vld [vmem:[#allocation5 + $0x208] sm:$0xff]  ;;  %vm132_vm0 = vcmask 719872   ;;  %vm522_vm1 = vcmask 130048  }
   0xd   :  { %271 = vmatpush.msra.mxu2 %v127_v0  ;;  %v840_v2 = vld [vmem:[#allocation5 + $0x238] sm:$0xff]  ;;  %v125_v3 = vld [vmem:[#allocation5 + $0x230] sm:$0xff]  ;;  %v843_v5 = vld [vmem:[#allocation5 + $0x200] sm:$0xff]  ;;  %s815_s0 = smov [#allocation7]   ;;  %s600_s25 = sshll.u32 %s1111_s2, 4  ;;  %s601_s25 = int_to_ptr.hbm [resolvable:$true] %s600_s25 }
   0xe   :  { %v113_v4 = vld [vmem:[#allocation5 + $0x1d0] sm:$0xff]  ;;  %702 = vmatpush.msra.mxu1 %v840_v2  ;;  %691 = vmatpush.msra.mxu3 %v125_v3  ;;  %v118_v6 = vld [vmem:[#allocation5 + $0x1f8] sm:$0xff]  ;;  %v845_v7 = vld [vmem:[#allocation5 + $0x1c8] sm:$0xff]  ;;  %s598_s1 = sshll.u32 %s815_s0, 4  ;;  %s599_s1 = int_to_ptr.vmem [resolvable:$true] %s598_s1 }
   0xf   :  { %272 = vmatpush.msra.mxu2 %v120_v1  ;;  %v111_v8 = vld [vmem:[#allocation5 + $0x1c0] sm:$0xff]  ;;  %171 = vmatpush.msra.mxu0 %v125_v3  ;;  %v106_v9 = vld [vmem:[#allocation5 + $0x198] sm:$0xff]  ;;  %v848_v10 = vld [vmem:[#allocation5 + $0x190] sm:$0xff] }
  0x10   :  { %703 = vmatpush.msra.mxu1 %v843_v5  ;;  %692 = vmatpush.msra.mxu3 %v118_v6  ;;  %v104_v11 = vld [vmem:[#allocation5 + $0x188] sm:$0xff]  ;;  %v99_v12 = vld [vmem:[#allocation5 + $0x160] sm:$0xff]  ;;  %v851_v13 = vld [vmem:[#allocation5 + $0x158] sm:$0xff] }
  0x11   :  { %273 = vmatpush.msra.mxu2 %v113_v4  ;;  %172 = vmatpush.msra.mxu0 %v118_v6  ;;  %v97_v14 = vld [vmem:[#allocation5 + $0x150] sm:$0xff]  ;;  %v92_v15 = vld [vmem:[#allocation5 + $0x128] sm:$0xff]  ;;  %v854_v16 = vld [vmem:[#allocation5 + $0x120] sm:$0xff] }
  0x12   :  { %704 = vmatpush.msra.mxu1 %v845_v7  ;;  %693 = vmatpush.msra.mxu3 %v111_v8  ;;  %v90_v17 = vld [vmem:[#allocation5 + $0x118] sm:$0xff]  ;;  %v85_v18 = vld [vmem:[#allocation5 + $0xf0] sm:$0xff]  ;;  %v857_v19 = vld [vmem:[#allocation5 + $0xe8] sm:$0xff] }
  0x13   :  { %274 = vmatpush.msra.mxu2 %v106_v9  ;;  %173 = vmatpush.msra.mxu0 %v111_v8  ;;  %v83_v20 = vld [vmem:[#allocation5 + $0xe0] sm:$0xff]  ;;  %v78_v21 = vld [vmem:[#allocation5 + $0xb8] sm:$0xff]  ;;  %v860_v22 = vld [vmem:[#allocation5 + $0xb0] sm:$0xff] }
  0x14   :  { %705 = vmatpush.msra.mxu1 %v848_v10  ;;  %694 = vmatpush.msra.mxu3 %v104_v11  ;;  %v76_v23 = vld [vmem:[#allocation5 + $0xa8] sm:$0xff]  ;;  %v71_v24 = vld [vmem:[#allocation5 + $0x80] sm:$0xff]  ;;  %v863_v25 = vld [vmem:[#allocation5 + $0x78] sm:$0xff] }
  0x15   :  { %275 = vmatpush.msra.mxu2 %v99_v12  ;;  %174 = vmatpush.msra.mxu0 %v104_v11  ;;  %v69_v26 = vld [vmem:[#allocation5 + $0x70] sm:$0xff]  ;;  %v64_v27 = vld [vmem:[#allocation5 + $0x48] sm:$0xff]  ;;  %v866_v28 = vld [vmem:[#allocation5 + $0x40] sm:$0xff] }
  0x16   :  { %706 = vmatpush.msra.mxu1 %v851_v13  ;;  %695 = vmatpush.msra.mxu3 %v97_v14  ;;  %v62_v29 = vld [vmem:[#allocation5 + $0x38] sm:$0xff]  ;;  %v57_v30 = vld [vmem:[#allocation5 + $0x10] sm:$0xff]  ;;  %v869_v31 = vld [vmem:[#allocation2] sm:$0xff] }
  0x17   :  { %276 = vmatpush.msra.mxu2 %v92_v15  ;;  %175 = vmatpush.msra.mxu0 %v97_v14  ;;  %v871_v32 = vld [vmem:[#allocation5 + $0x8] sm:$0xff]  ;;  %v873_v33 = vld [vmem:[#allocation5 + $0x260] sm:$0xff]  ;;  %v876_v34 = vld [vmem:[#allocation2 + $0x10] sm:$0xff] }
  0x18   :  { %707 = vmatpush.msra.mxu1 %v854_v16  ;;  %696 = vmatpush.msra.mxu3 %v90_v17  ;;  %v130_v35 = vld [vmem:[#allocation5 + $0x258] sm:$0xff]  ;;  %v55_v36 = vld [vmem:[#allocation5] sm:$0xff]  ;;  %v883_v38 = vld [vmem:[#allocation5 + $0x228] sm:$0xff] }
  0x19   :  { %277 = vmatpush.msra.mxu2 %v85_v18  ;;  %176 = vmatpush.msra.mxu0 %v90_v17  ;;  %v881_v37 = vld [vmem:[#allocation2 + $0x18] sm:$0xff]  ;;  %v128_v39 = vld [vmem:[#allocation5 + $0x248] sm:$0xff]  ;;  %v888_v41 = vld [vmem:[#allocation5 + $0x1f0] sm:$0xff] }
  0x1a   :  { %708 = vmatpush.msra.mxu1 %v857_v19  ;;  %697 = vmatpush.msra.mxu3 %v83_v20  ;;  %v123_v40 = vld [vmem:[#allocation5 + $0x220] sm:$0xff]  ;;  %v121_v42 = vld [vmem:[#allocation5 + $0x210] sm:$0xff]  ;;  %v116_v43 = vld [vmem:[#allocation5 + $0x1e8] sm:$0xff] }
  0x1b   :  { %278 = vmatpush.msra.mxu2 %v78_v21  ;;  %177 = vmatpush.msra.mxu0 %v83_v20  ;;  %v893_v44 = vld [vmem:[#allocation2 + $0x8] sm:$0xff]  ;;  %v114_v45 = vld [vmem:[#allocation5 + $0x1d8] sm:$0xff]  ;;  %v107_v47 = vld [vmem:[#allocation5 + $0x1a0] sm:$0xff] }
  0x1c   :  { %709 = vmatpush.msra.mxu1 %v860_v22  ;;  %698 = vmatpush.msra.mxu3 %v76_v23  ;;  %v899_v46 = vld [vmem:[#allocation5 + $0x1b8] sm:$0xff]  ;;  %v903_v48 = vld [vmem:[#allocation2 + $0x20] sm:$0xff]  ;;  %v109_v49 = vld [vmem:[#allocation5 + $0x1b0] sm:$0xff] }
  0x1d   :  { %279 = vmatpush.msra.mxu2 %v71_v24  ;;  %178 = vmatpush.msra.mxu0 %v76_v23  ;;  %v100_v50 = vld [vmem:[#allocation5 + $0x168] sm:$0xff]  ;;  %v909_v51 = vld [vmem:[#allocation5 + $0x180] sm:$0xff]  ;;  %v102_v52 = vld [vmem:[#allocation5 + $0x178] sm:$0xff] }
  0x1e   :  { %710 = vmatpush.msra.mxu1 %v863_v25  ;;  %699 = vmatpush.msra.mxu3 %v69_v26  ;;  %v93_v53 = vld [vmem:[#allocation5 + $0x130] sm:$0xff]  ;;  %v914_v54 = vld [vmem:[#allocation5 + $0x148] sm:$0xff]  ;;  %v95_v55 = vld [vmem:[#allocation5 + $0x140] sm:$0xff] }
  0x1f   :  { %280 = vmatpush.msra.mxu2 %v64_v27  ;;  %179 = vmatpush.msra.mxu0 %v69_v26  ;;  %v86_v56 = vld [vmem:[#allocation5 + $0xf8] sm:$0xff]  ;;  %v922_v57 = vld [vmem:[#allocation2 + $0x28] sm:$0xff]  ;;  %v88_v58 = vld [vmem:[#allocation5 + $0x108] sm:$0xff] }
  0x20   :  { %711 = vmatpush.msra.mxu1 %v866_v28  ;;  %700 = vmatpush.msra.mxu3 %v62_v29  ;;  %v929_v59 = vld [vmem:[#allocation5 + $0x110] sm:$0xff]  ;;  %v79_v60 = vld [vmem:[#allocation5 + $0xc0] sm:$0xff]  ;;  %v72_v62 = vld [vmem:[#allocation5 + $0x88] sm:$0xff] }
  0x21   :  { %281 = vmatpush.msra.mxu2 %v57_v30  ;;  %180 = vmatpush.msra.mxu0 %v62_v29  ;;  %v81_v61 = vld [vmem:[#allocation5 + $0xd0] sm:$0xff]  ;;  %v939_v63 = vld [vmem:[#allocation2 + $0x30] sm:$0xff]  ;;  %v108_v6 = vld [vmem:[#allocation5 + $0x1a8] sm:$0xff] }
  0x22   :  { %636 = vmatmul.msk.f32.vlgmr.msra.gmra.mxu2 %vm132_vm0, %v869_v31  ;;  %712 = vmatpush.msra.mxu1 %v871_v32  ;;  %v943_v0 = vld [vmem:[#allocation5 + $0xd8] sm:$0xff]  ;;  %v129_v1 = vld [vmem:[#allocation5 + $0x250] sm:$0xff]  ;;  %v75_v8 = vld [vmem:[#allocation5 + $0xa0] sm:$0xff] }
  0x23   :  { %713 = vmatpush.msrb.mxu2 %v873_v33  ;;  %627 = vmatmul.msk.f32.vlgmr.msra.gmra.mxu1 %vm132_vm0, %v876_v34  ;;  %v65_v3 = vld [vmem:[#allocation5 + $0x50] sm:$0xff]  ;;  %v122_v4 = vld [vmem:[#allocation5 + $0x218] sm:$0xff]  ;;  %v67_v9 = vld [vmem:[#allocation5 + $0x60] sm:$0xff] }
  0x24   :  { %421 = vmatpush.msrb.mxu1 %v130_v35  ;;  %701 = vmatpush.msra.mxu3 %v55_v36  ;;  %v58_v11 = vld [vmem:[#allocation5 + $0x18] sm:$0xff]  ;;  %v80_v14 = vld [vmem:[#allocation5 + $0xc8] sm:$0xff]  ;;  %v73_v18 = vld [vmem:[#allocation5 + $0x90] sm:$0xff] }
  0x25   :  { %617 = vmatmul.msk.f32.vlgmr.msra.gmra.mxu3 %vm132_vm0, %v881_v37  ;;  %714 = vmatpush.msrb.mxu2 %v883_v38  ;;  %v94_v12 = vld [vmem:[#allocation5 + $0x138] sm:$0xff]  ;;  %v964_v15 = vld [vmem:[#allocation2 + $0x40] sm:$0xff]  ;;  %v59_v20 = vld [vmem:[#allocation5 + $0x20] sm:$0xff] }
  0x26   :  { %321 = vmatpush.msrb.mxu3 %v128_v39  ;;  %422 = vmatpush.msrb.mxu1 %v123_v40  ;;  %v68_v17 = vld [vmem:[#allocation5 + $0x68] sm:$0xff]  ;;  %v974_v21 = vld [vmem:[#allocation2 + $0x48] sm:$0xff]  ;;  %v987_v23 = vld [vmem:[#allocation2 + $0x50] sm:$0xff] }
  0x27   :  { %715 = vmatpush.msrb.mxu2 %v888_v41  ;;  %181 = vmatpush.msra.mxu0 %v55_v36 }
  0x28   :  { %322 = vmatpush.msrb.mxu3 %v121_v42  ;;  %423 = vmatpush.msrb.mxu1 %v116_v43 }
  0x29   :  { %221 = vmatpush.msrb.mxu0 %v840_v2  ;;  %716 = vmatpush.msrb.mxu2 %v899_v46  ;;  %v74_v2 = vld [vmem:[#allocation5 + $0x98] sm:$0xff] }
  0x2a   :  { %614 = vmatmul.msk.f32.vlgmr.msra.gmra.mxu0 %vm132_vm0, %v869_v31  ;;  %637 = vmatmul.msk.f32.gmra.mxu2 %vm132_vm0, %v893_v44 }
  0x2b   :  { %323 = vmatpush.msrb.mxu3 %v114_v45  ;;  %628 = vmatmul.msk.f32.gmra.mxu1 %vm132_vm0, %v881_v37 }
  0x2c   :  { %222 = vmatpush.msrb.mxu0 %v843_v5  ;;  %424 = vmatpush.msrb.mxu1 %v109_v49  ;;  %v115_v5 = vld [vmem:[#allocation5 + $0x1e0] sm:$0xff] }
  0x2d   :  { %324 = vmatpush.msrb.mxu3 %v107_v47  ;;  %717 = vmatpush.msrb.mxu2 %v909_v51 }
  0x2e   :  { %618 = vmatmul.msk.f32.gmra.mxu3 %vm132_vm0, %v903_v48  ;;  %223 = vmatpush.msrb.mxu0 %v845_v7  ;;  %v954_v7 = vld [vmem:[#allocation2 + $0x38] sm:$0xff] }
  0x2f   :  { %325 = vmatpush.msrb.mxu3 %v100_v50  ;;  %425 = vmatpush.msrb.mxu1 %v102_v52 }
  0x30   :  { %224 = vmatpush.msrb.mxu0 %v848_v10  ;;  %718 = vmatpush.msrb.mxu2 %v914_v54  ;;  %v101_v10 = vld [vmem:[#allocation5 + $0x170] sm:$0xff] }
  0x31   :  { %326 = vmatpush.msrb.mxu3 %v93_v53  ;;  %426 = vmatpush.msrb.mxu1 %v95_v55 }
  0x32   :  { %225 = vmatpush.msrb.mxu0 %v851_v13  ;;  %638 = vmatmul.msk.f32.gmra.mxu2 %vm132_vm0, %v876_v34  ;;  %v87_v13 = vld [vmem:[#allocation5 + $0x100] sm:$0xff] }
  0x33   :  { %615 = vmatmul.msk.f32.gmra.mxu0 %vm132_vm0, %v893_v44  ;;  %629 = vmatmul.msk.f32.gmra.mxu1 %vm132_vm0, %v903_v48 }
  0x34   :  { %226 = vmatpush.msrb.mxu0 %v854_v16  ;;  %327 = vmatpush.msrb.mxu3 %v86_v56  ;;  %v60_v16 = vld [vmem:[#allocation5 + $0x28] sm:$0xff] }
  0x35   :  { %427 = vmatpush.msrb.mxu1 %v88_v58  ;;  %719 = vmatpush.msrb.mxu2 %v929_v59 }
  0x36   :  { %619 = vmatmul.msk.f32.gmra.mxu3 %vm132_vm0, %v922_v57  ;;  %227 = vmatpush.msrb.mxu0 %v857_v19  ;;  %v66_v19 = vld [vmem:[#allocation5 + $0x58] sm:$0xff] }
  0x37   :  { %328 = vmatpush.msrb.mxu3 %v79_v60  ;;  %428 = vmatpush.msrb.mxu1 %v81_v61 }
  0x38   :  { %228 = vmatpush.msrb.mxu0 %v860_v22  ;;  %720 = vmatpush.msrb.mxu2 %v943_v0  ;;  %v61_v22 = vld [vmem:[#allocation5 + $0x30] sm:$0xff] }
  0x39   :  { %329 = vmatpush.msrb.mxu3 %v72_v62  ;;  %429 = vmatpush.msrb.mxu1 %v74_v2 }
  0x3a   :  { %229 = vmatpush.msrb.mxu0 %v863_v25  ;;  %639 = vmatmul.msk.f32.gmra.mxu2 %vm132_vm0, %v881_v37 }
  0x3b   :  { %616 = vmatmul.msk.f32.gmra.mxu0 %vm132_vm0, %v876_v34  ;;  %630 = vmatmul.msk.f32.gmra.mxu1 %vm132_vm0, %v922_v57 }
  0x3c   :  { %230 = vmatpush.msrb.mxu0 %v866_v28  ;;  %330 = vmatpush.msrb.mxu3 %v65_v3 }
  0x3d   :  { %721 = vmatpush.msrb.mxu2 %v75_v8  ;;  %430 = vmatpush.msrb.mxu1 %v67_v9 }
  0x3e   :  { %620 = vmatmul.msk.f32.gmra.mxu3 %vm132_vm0, %v939_v63  ;;  %231 = vmatpush.msrb.mxu0 %v871_v32 }
  0x3f   :  { %331 = vmatpush.msrb.mxu3 %v58_v11  ;;  %431 = vmatpush.msrb.mxu1 %v60_v16 }
  0x40   :  { %371 = vmatpush.msra.mxu0 %v129_v1  ;;  %722 = vmatpush.msrb.mxu2 %v68_v17 }
  0x42   :  { %372 = vmatpush.msra.mxu0 %v122_v4  ;;  %640 = vmatmul.msk.f32.gmra.mxu2 %vm132_vm0, %v903_v48 }
  0x43   :  { %631 = vmatmul.msk.f32.gmra.mxu1 %vm132_vm0, %v939_v63  ;;  %625 = vmatmul.msk.f32.vlgmr.msrb.gmra.mxu0 %vm132_vm0, %v869_v31 }
  0x44   :  { %373 = vmatpush.msra.mxu0 %v115_v5  ;;  %723 = vmatpush.msrb.mxu2 %v61_v22 }
  0x46   :  { %374 = vmatpush.msra.mxu0 %v108_v6  ;;  %621 = vmatmul.msk.f32.gmra.mxu3 %vm132_vm0, %v954_v7 }
  0x48   :  { %375 = vmatpush.msra.mxu0 %v101_v10 }
  0x4a   :  { %376 = vmatpush.msra.mxu0 %v94_v12  ;;  %641 = vmatmul.msk.f32.gmra.mxu2 %vm132_vm0, %v922_v57 }
  0x4b   :  { %632 = vmatmul.msk.f32.gmra.mxu1 %vm132_vm0, %v954_v7  ;;  %626 = vmatmul.msk.f32.gmra.mxu0 %vm132_vm0, %v893_v44 }
  0x4c   :  { %377 = vmatpush.msra.mxu0 %v87_v13 }
  0x4e   :  { %378 = vmatpush.msra.mxu0 %v80_v14  ;;  %622 = vmatmul.msk.f32.gmra.mxu3 %vm132_vm0, %v964_v15 }
  0x50   :  { %379 = vmatpush.msra.mxu0 %v73_v18 }
  0x52   :  { %380 = vmatpush.msra.mxu0 %v66_v19  ;;  %642 = vmatmul.msk.f32.gmra.mxu2 %vm132_vm0, %v939_v63 }
  0x53   :  { %633 = vmatmul.msk.f32.gmra.mxu1 %vm132_vm0, %v964_v15 }
  0x54   :  { %381 = vmatpush.msra.mxu0 %v59_v20 }
  0x55   :  { %658 = vmatmul.msk.f32.vlgmr.msra.gmra.mxu0 %vm132_vm0, %v869_v31 }
  0x56   :  { %471 = vmatpush.msrb.mxu0 %v873_v33  ;;  %623 = vmatmul.msk.f32.gmra.mxu3 %vm132_vm0, %v974_v21 }
  0x58   :  { %472 = vmatpush.msrb.mxu0 %v883_v38 }
  0x5a   :  { %473 = vmatpush.msrb.mxu0 %v888_v41  ;;  %643 = vmatmul.msk.f32.gmra.mxu2 %vm132_vm0, %v954_v7 }
  0x5b   :  { %634 = vmatmul.msk.f32.gmra.mxu1 %vm132_vm0, %v974_v21 }
  0x5c   :  { %474 = vmatpush.msrb.mxu0 %v899_v46 }
  0x5d   :  { %659 = vmatmul.msk.f32.gmra.mxu0 %vm132_vm0, %v893_v44 }
  0x5e   :  { %475 = vmatpush.msrb.mxu0 %v909_v51  ;;  %624 = vmatmul.msk.f32.gmra.mxu3 %vm132_vm0, %v987_v23 }
  0x60   :  { %476 = vmatpush.msrb.mxu0 %v914_v54 }
  0x62   :  { %477 = vmatpush.msrb.mxu0 %v929_v59  ;;  %644 = vmatmul.msk.f32.gmra.mxu2 %vm132_vm0, %v964_v15 }
  0x63   :  { %635 = vmatmul.msk.f32.gmra.mxu1 %vm132_vm0, %v987_v23 }
  0x64   :  { %478 = vmatpush.msrb.mxu0 %v943_v0 }
  0x65   :  { %660 = vmatmul.msk.f32.gmra.mxu0 %vm132_vm0, %v876_v34 }
  0x66   :  { %479 = vmatpush.msrb.mxu0 %v75_v8  ;;  %647 = vmatmul.msk.f32.vlgmr.msrb.gmra.mxu3 %vm132_vm0, %v869_v31 }
  0x68   :  { %480 = vmatpush.msrb.mxu0 %v68_v17 }
  0x6a   :  { %481 = vmatpush.msrb.mxu0 %v61_v22  ;;  %645 = vmatmul.msk.f32.gmra.mxu2 %vm132_vm0, %v974_v21 }
  0x6b   :  { %669 = vmatmul.msk.f32.vlgmr.msrb.gmra.mxu1 %vm132_vm0, %v869_v31 }
  0x6d   :  { %661 = vmatmul.msk.f32.gmra.mxu0 %vm132_vm0, %v881_v37 }
  0x6e   :  { %648 = vmatmul.msk.f32.gmra.mxu3 %vm132_vm0, %v893_v44 }
  0x72   :  { %646 = vmatmul.msk.f32.gmra.mxu2 %vm132_vm0, %v987_v23 }
  0x73   :  { %670 = vmatmul.msk.f32.gmra.mxu1 %vm132_vm0, %v893_v44 }
  0x75   :  { %662 = vmatmul.msk.f32.gmra.mxu0 %vm132_vm0, %v903_v48 }
  0x76   :  { %649 = vmatmul.msk.f32.gmra.mxu3 %vm132_vm0, %v876_v34 }
  0x7a   :  { %682 = vmatmul.msk.f32.vlgmr.msrb.gmra.mxu2 %vm132_vm0, %v876_v34 }
  0x7b   :  { %671 = vmatmul.msk.f32.gmra.mxu1 %vm132_vm0, %v876_v34 }
  0x7d   :  { %663 = vmatmul.msk.f32.gmra.mxu0 %vm132_vm0, %v922_v57 }
  0x7e   :  { %650 = vmatmul.msk.f32.gmra.mxu3 %vm132_vm0, %v881_v37 }
  0x82   :  { %683 = vmatmul.msk.f32.gmra.mxu2 %vm132_vm0, %v881_v37 }
  0x83   :  { %672 = vmatmul.msk.f32.gmra.mxu1 %vm132_vm0, %v881_v37 }
  0x85   :  { %664 = vmatmul.msk.f32.gmra.mxu0 %vm132_vm0, %v939_v63 }
  0x86   :  { %651 = vmatmul.msk.f32.gmra.mxu3 %vm132_vm0, %v903_v48 }
  0x8a   :  { %684 = vmatmul.msk.f32.gmra.mxu2 %vm132_vm0, %v903_v48 }
  0x8b   :  { %673 = vmatmul.msk.f32.gmra.mxu1 %vm132_vm0, %v903_v48 }
  0x8d   :  { %665 = vmatmul.msk.f32.gmra.mxu0 %vm132_vm0, %v954_v7 }
  0x8e   :  { %652 = vmatmul.msk.f32.gmra.mxu3 %vm132_vm0, %v922_v57 }
  0x92   :  { %685 = vmatmul.msk.f32.gmra.mxu2 %vm132_vm0, %v922_v57 }
  0x93   :  { %674 = vmatmul.msk.f32.gmra.mxu1 %vm132_vm0, %v922_v57 }
  0x95   :  { %666 = vmatmul.msk.f32.gmra.mxu0 %vm132_vm0, %v964_v15 }
  0x96   :  { %653 = vmatmul.msk.f32.gmra.mxu3 %vm132_vm0, %v939_v63 }
  0x9a   :  { %686 = vmatmul.msk.f32.gmra.mxu2 %vm132_vm0, %v939_v63 }
  0x9b   :  { %675 = vmatmul.msk.f32.gmra.mxu1 %vm132_vm0, %v939_v63 }
  0x9d   :  { %667 = vmatmul.msk.f32.gmra.mxu0 %vm132_vm0, %v974_v21 }
  0x9e   :  { %654 = vmatmul.msk.f32.gmra.mxu3 %vm132_vm0, %v954_v7 }
  0xa0   :  { %v239_v24 = vpop.f32.mrf.mxu1 }
  0xa1   :  { %532 = vst [vmem:[#allocation7 + $0x78] sm:$0xff] %v239_v24 }
  0xa2   :  { %687 = vmatmul.msk.f32.gmra.mxu2 %vm132_vm0, %v954_v7 }
  0xa3   :  { %676 = vmatmul.msk.f32.gmra.mxu1 %vm132_vm0, %v954_v7 }
  0xa5   :  { %668 = vmatmul.msk.f32.gmra.mxu0 %vm132_vm0, %v987_v23  ;;  %v283_v25 = vpop.f32.mrf.mxu2 }
  0xa6   :  { %655 = vmatmul.msk.f32.gmra.mxu3 %vm132_vm0, %v964_v15  ;;  %518 = vst [vmem:[#allocation7 + $0x10] sm:$0xff] %v283_v25 }
  0xa7   :  { %v183_v26 = vpop.f32.mrf.mxu0 }
  0xa8   :  { %516 = vst [vmem:[#allocation7] sm:$0xff] %v183_v26  ;;  %v192_v27 = vpop.f32.mrf.mxu3  ;;  %v242_v28 = vpop.f32.mrf.mxu1 }
  0xa9   :  { %538 = vst [vmem:[#allocation7 + $0xa8] sm:$0xff] %v192_v27 }
  0xaa   :  { %688 = vmatmul.msk.f32.gmra.mxu2 %vm132_vm0, %v964_v15  ;;  %539 = vst [vmem:[#allocation7 + $0xb0] sm:$0xff] %v242_v28 }
  0xab   :  { %677 = vmatmul.msk.f32.gmra.mxu1 %vm132_vm0, %v964_v15 }
  0xad   :  { %680 = vmatmul.msk.f32.vlgmr.msrb.gmra.mxu0 %vm132_vm0, %v869_v31  ;;  %v286_v29 = vpop.f32.mrf.mxu2 }
  0xae   :  { %656 = vmatmul.msk.f32.gmra.mxu3 %vm132_vm0, %v974_v21  ;;  %526 = vst [vmem:[#allocation7 + $0x48] sm:$0xff] %v286_v29 }
  0xb0   :  { %v186_v30 = vpop.f32.mrf.mxu0  ;;  %v245_v33 = vpop.f32.mrf.mxu1 }
  0xb1   :  { %v195_v32 = vpop.f32.mrf.mxu3  ;;  %524 = vst [vmem:[#allocation7 + $0x38] sm:$0xff] %v186_v30 }
  0xb2   :  { %545 = vst [vmem:[#allocation7 + $0xe0] sm:$0xff] %v195_v32  ;;  %689 = vmatmul.msk.f32.gmra.mxu2 %vm132_vm0, %v974_v21 }
  0xb3   :  { %546 = vst [vmem:[#allocation7 + $0xe8] sm:$0xff] %v245_v33  ;;  %678 = vmatmul.msk.f32.gmra.mxu1 %vm132_vm0, %v974_v21 }
  0xb5   :  { %681 = vmatmul.msk.f32.gmra.mxu0 %vm132_vm0, %v893_v44  ;;  %v289_v31 = vpop.f32.mrf.mxu2 }
  0xb6   :  { %657 = vmatmul.msk.f32.gmra.mxu3 %vm132_vm0, %v987_v23  ;;  %533 = vst [vmem:[#allocation7 + $0x80] sm:$0xff] %v289_v31 }
  0xb8   :  { %v189_v34 = vpop.f32.mrf.mxu0  ;;  %v248_v36 = vpop.f32.mrf.mxu1 }
  0xb9   :  { %v198_v35 = vpop.f32.mrf.mxu3  ;;  %531 = vst [vmem:[#allocation7 + $0x70] sm:$0xff] %v189_v34 }
  0xba   :  { %552 = vst [vmem:[#allocation7 + $0x118] sm:$0xff] %v198_v35  ;;  %690 = vmatmul.msk.f32.gmra.mxu2 %vm132_vm0, %v987_v23 }
  0xbb   :  { %553 = vst [vmem:[#allocation7 + $0x120] sm:$0xff] %v248_v36  ;;  %679 = vmatmul.msk.f32.gmra.mxu1 %vm132_vm0, %v987_v23 }
  0xbd   :  { %v292_v37 = vpop.f32.mrf.mxu2 }
  0xbe   :  { %540 = vst [vmem:[#allocation7 + $0xb8] sm:$0xff] %v292_v37 }
  0xc0   :  { %v251_v39 = vpop.f32.mrf.mxu1  ;;  %v233_v40 = vpop.f32.mrf.mxu0 }
  0xc1   :  { %v201_v38 = vpop.f32.mrf.mxu3  ;;  %560 = vst [vmem:[#allocation7 + $0x158] sm:$0xff] %v251_v39 }
  0xc2   :  { %559 = vst [vmem:[#allocation7 + $0x150] sm:$0xff] %v201_v38 }
  0xc3   :  { %517 = vst [vmem:[#allocation7 + $0x8] sm:$0xff] %v233_v40 }
  0xc5   :  { %v295_v41 = vpop.f32.mrf.mxu2 }
  0xc6   :  { %547 = vst [vmem:[#allocation7 + $0xf0] sm:$0xff] %v295_v41 }
  0xc8   :  { %v254_v43 = vpop.f32.mrf.mxu1  ;;  %v236_v44 = vpop.f32.mrf.mxu0 }
  0xc9   :  { %v204_v42 = vpop.f32.mrf.mxu3  ;;  %567 = vst [vmem:[#allocation7 + $0x190] sm:$0xff] %v254_v43 }
  0xca   :  { %566 = vst [vmem:[#allocation7 + $0x188] sm:$0xff] %v204_v42 }
  0xcb   :  { %525 = vst [vmem:[#allocation7 + $0x40] sm:$0xff] %v236_v44 }
  0xcd   :  { %v298_v45 = vpop.f32.mrf.mxu2 }
  0xce   :  { %554 = vst [vmem:[#allocation7 + $0x128] sm:$0xff] %v298_v45 }
  0xd0   :  { %v257_v47 = vpop.f32.mrf.mxu1 }
  0xd1   :  { %v207_v46 = vpop.f32.mrf.mxu3  ;;  %574 = vst [vmem:[#allocation7 + $0x1c8] sm:$0xff] %v257_v47 }
  0xd2   :  { %573 = vst [vmem:[#allocation7 + $0x1c0] sm:$0xff] %v207_v46  ;;  %v383_v48 = vpop.f32.mrf.mxu0 }
  0xd3   :  { %520 = vst [vmem:[#allocation7 + $0x20] sm:$0xff] %v383_v48 }
  0xd5   :  { %v301_v49 = vpop.f32.mrf.mxu2 }
  0xd6   :  { %561 = vst [vmem:[#allocation7 + $0x160] sm:$0xff] %v301_v49 }
  0xd8   :  { %v260_v51 = vpop.f32.mrf.mxu1 }
  0xd9   :  { %v210_v50 = vpop.f32.mrf.mxu3  ;;  %581 = vst [vmem:[#allocation7 + $0x200] sm:$0xff] %v260_v51 }
  0xda   :  { %580 = vst [vmem:[#allocation7 + $0x1f8] sm:$0xff] %v210_v50  ;;  %v386_v52 = vpop.f32.mrf.mxu0 }
  0xdb   :  { %528 = vst [vmem:[#allocation7 + $0x58] sm:$0xff] %v386_v52 }
  0xdd   :  { %v304_v53 = vpop.f32.mrf.mxu2 }
  0xde   :  { %568 = vst [vmem:[#allocation7 + $0x198] sm:$0xff] %v304_v53 }
  0xe0   :  { %v263_v55 = vpop.f32.mrf.mxu1 }
  0xe1   :  { %v213_v54 = vpop.f32.mrf.mxu3  ;;  %588 = vst [vmem:[#allocation7 + $0x238] sm:$0xff] %v263_v55 }
  0xe2   :  { %587 = vst [vmem:[#allocation7 + $0x230] sm:$0xff] %v213_v54  ;;  %v389_v56 = vpop.f32.mrf.mxu0 }
  0xe3   :  { %535 = vst [vmem:[#allocation7 + $0x90] sm:$0xff] %v389_v56 }
  0xe5   :  { %v307_v57 = vpop.f32.mrf.mxu2 }
  0xe6   :  { %575 = vst [vmem:[#allocation7 + $0x1d0] sm:$0xff] %v307_v57 }
  0xe8   :  { %v433_v59 = vpop.f32.mrf.mxu1 }
  0xe9   :  { %v333_v58 = vpop.f32.mrf.mxu3  ;;  %521 = vst [vmem:[#allocation7 + $0x28] sm:$0xff] %v433_v59 }
  0xea   :  { %519 = vst [vmem:[#allocation7 + $0x18] sm:$0xff] %v333_v58  ;;  %v392_v60 = vpop.f32.mrf.mxu0 }
  0xeb   :  { %542 = vst [vmem:[#allocation7 + $0xc8] sm:$0xff] %v392_v60 }
  0xed   :  { %v310_v61 = vpop.f32.mrf.mxu2 }
  0xee   :  { %582 = vst [vmem:[#allocation7 + $0x208] sm:$0xff] %v310_v61 }
  0xf0   :  { %v436_v63 = vpop.f32.mrf.mxu1 }
  0xf1   :  { %v336_v62 = vpop.f32.mrf.mxu3  ;;  %529 = vst [vmem:[#allocation7 + $0x60] sm:$0xff] %v436_v63 }
  0xf2   :  { %527 = vst [vmem:[#allocation7 + $0x50] sm:$0xff] %v336_v62  ;;  %v395_v0 = vpop.f32.mrf.mxu0 }
  0xf3   :  { %549 = vst [vmem:[#allocation7 + $0x100] sm:$0xff] %v395_v0 }
  0xf5   :  { %v313_v1 = vpop.f32.mrf.mxu2 }
  0xf6   :  { %589 = vst [vmem:[#allocation7 + $0x240] sm:$0xff] %v313_v1 }
  0xf8   :  { %v439_v3 = vpop.f32.mrf.mxu1 }
  0xf9   :  { %v339_v2 = vpop.f32.mrf.mxu3  ;;  %536 = vst [vmem:[#allocation7 + $0x98] sm:$0xff] %v439_v3 }
  0xfa   :  { %534 = vst [vmem:[#allocation7 + $0x88] sm:$0xff] %v339_v2  ;;  %v398_v4 = vpop.f32.mrf.mxu0 }
  0xfb   :  { %556 = vst [vmem:[#allocation7 + $0x138] sm:$0xff] %v398_v4 }
  0xfd   :  { %v489_v5 = vpop.f32.mrf.mxu2 }
  0xfe   :  { %537 = vst.msk [vmem:[#allocation7 + $0xa0] sm:$0xff] %vm522_vm1, %v489_v5 }
 0x100   :  { %v442_v7 = vpop.f32.mrf.mxu1 }
 0x101   :  { %v342_v6 = vpop.f32.mrf.mxu3  ;;  %543 = vst [vmem:[#allocation7 + $0xd0] sm:$0xff] %v442_v7 }
 0x102   :  { %541 = vst [vmem:[#allocation7 + $0xc0] sm:$0xff] %v342_v6  ;;  %v401_v8 = vpop.f32.mrf.mxu0 }
 0x103   :  { %563 = vst [vmem:[#allocation7 + $0x170] sm:$0xff] %v401_v8 }
 0x105   :  { %v492_v9 = vpop.f32.mrf.mxu2 }
 0x106   :  { %544 = vst.msk [vmem:[#allocation7 + $0xd8] sm:$0xff] %vm522_vm1, %v492_v9 }
 0x108   :  { %v445_v11 = vpop.f32.mrf.mxu1 }
 0x109   :  { %v345_v10 = vpop.f32.mrf.mxu3  ;;  %550 = vst [vmem:[#allocation7 + $0x108] sm:$0xff] %v445_v11 }
 0x10a   :  { %548 = vst [vmem:[#allocation7 + $0xf8] sm:$0xff] %v345_v10  ;;  %v404_v12 = vpop.f32.mrf.mxu0 }
 0x10b   :  { %570 = vst [vmem:[#allocation7 + $0x1a8] sm:$0xff] %v404_v12 }
 0x10d   :  { %v495_v13 = vpop.f32.mrf.mxu2 }
 0x10e   :  { %551 = vst.msk [vmem:[#allocation7 + $0x110] sm:$0xff] %vm522_vm1, %v495_v13 }
 0x110   :  { %v448_v15 = vpop.f32.mrf.mxu1 }
 0x111   :  { %v348_v14 = vpop.f32.mrf.mxu3  ;;  %557 = vst [vmem:[#allocation7 + $0x140] sm:$0xff] %v448_v15 }
 0x112   :  { %555 = vst [vmem:[#allocation7 + $0x130] sm:$0xff] %v348_v14  ;;  %v407_v16 = vpop.f32.mrf.mxu0 }
 0x113   :  { %577 = vst [vmem:[#allocation7 + $0x1e0] sm:$0xff] %v407_v16 }
 0x115   :  { %v498_v17 = vpop.f32.mrf.mxu2 }
 0x116   :  { %558 = vst.msk [vmem:[#allocation7 + $0x148] sm:$0xff] %vm522_vm1, %v498_v17 }
 0x118   :  { %v451_v19 = vpop.f32.mrf.mxu1 }
 0x119   :  { %v351_v18 = vpop.f32.mrf.mxu3  ;;  %564 = vst [vmem:[#allocation7 + $0x178] sm:$0xff] %v451_v19 }
 0x11a   :  { %562 = vst [vmem:[#allocation7 + $0x168] sm:$0xff] %v351_v18  ;;  %v410_v20 = vpop.f32.mrf.mxu0 }
 0x11b   :  { %584 = vst [vmem:[#allocation7 + $0x218] sm:$0xff] %v410_v20 }
 0x11d   :  { %v501_v21 = vpop.f32.mrf.mxu2 }
 0x11e   :  { %565 = vst.msk [vmem:[#allocation7 + $0x180] sm:$0xff] %vm522_vm1, %v501_v21 }
 0x120   :  { %v454_v23 = vpop.f32.mrf.mxu1 }
 0x121   :  { %v354_v22 = vpop.f32.mrf.mxu3  ;;  %571 = vst [vmem:[#allocation7 + $0x1b0] sm:$0xff] %v454_v23 }
 0x122   :  { %569 = vst [vmem:[#allocation7 + $0x1a0] sm:$0xff] %v354_v22  ;;  %v413_v24 = vpop.f32.mrf.mxu0 }
 0x123   :  { %591 = vst [vmem:[#allocation7 + $0x250] sm:$0xff] %v413_v24 }
 0x125   :  { %v504_v25 = vpop.f32.mrf.mxu2 }
 0x126   :  { %572 = vst.msk [vmem:[#allocation7 + $0x1b8] sm:$0xff] %vm522_vm1, %v504_v25 }
 0x128   :  { %v457_v27 = vpop.f32.mrf.mxu1 }
 0x129   :  { %v357_v26 = vpop.f32.mrf.mxu3  ;;  %578 = vst [vmem:[#allocation7 + $0x1e8] sm:$0xff] %v457_v27 }
 0x12a   :  { %576 = vst [vmem:[#allocation7 + $0x1d8] sm:$0xff] %v357_v26  ;;  %v483_v28 = vpop.f32.mrf.mxu0 }
 0x12b   :  { %523 = vst.msk [vmem:[#allocation7 + $0x30] sm:$0xff] %vm522_vm1, %v483_v28 }
 0x12d   :  { %v507_v29 = vpop.f32.mrf.mxu2 }
 0x12e   :  { %579 = vst.msk [vmem:[#allocation7 + $0x1f0] sm:$0xff] %vm522_vm1, %v507_v29 }
 0x130   :  { %v460_v32 = vpop.f32.mrf.mxu1 }
 0x131   :  { %v360_v30 = vpop.f32.mrf.mxu3  ;;  %585 = vst [vmem:[#allocation7 + $0x220] sm:$0xff] %v460_v32 }
 0x132   :  { %583 = vst [vmem:[#allocation7 + $0x210] sm:$0xff] %v360_v30  ;;  %v486_v33 = vpop.f32.mrf.mxu0 }
 0x133   :  { %530 = vst.msk [vmem:[#allocation7 + $0x68] sm:$0xff] %vm522_vm1, %v486_v33 }
 0x135   :  { %v510_v31 = vpop.f32.mrf.mxu2 }
 0x136   :  { %586 = vst.msk [vmem:[#allocation7 + $0x228] sm:$0xff] %vm522_vm1, %v510_v31 }
 0x138   :  { %v463_v35 = vpop.f32.mrf.mxu1 }
 0x139   :  { %v363_v34 = vpop.f32.mrf.mxu3  ;;  %592 = vst [vmem:[#allocation7 + $0x258] sm:$0xff] %v463_v35 }
 0x13a   :  { %590 = vst [vmem:[#allocation7 + $0x248] sm:$0xff] %v363_v34 }
 0x13d   :  { %v513_v36 = vpop.f32.mrf.mxu2 }
 0x13e   :  { %593 = vst.msk [vmem:[#allocation7 + $0x260] sm:$0xff] %vm522_vm1, %v513_v36 }
 0x13f   :  { %606 = dma.vmem_to_hbm [thread:$0]  %s599_s1, 9856, %s601_s25, [#allocation4], %s813_s21, %s813_s21, %s814_s22  }
 0x140   :  { %807 = dma.done.wait [#allocation4], 9856  }
 0x141   :  { %808 = vsyncadd [#allocation4], 4294957440 }
 0x142   :  { %611 = vsyncpa [#allocation3], 1 }
 0x143   :  { %612 = vsyncpa [#allocation6], 1 }
 0x144   :  { %613 = vsyncpa [#allocation4], 1 }

</bundles_post_ra>
